<compile_context>
chip_gen: v6e
topology: v6e:2x2x1
jax: 0.10.0
libtpu: 0.0.40
codegen_flags: <defaults>
</compile_context>

<pallas_src>
import jax
import jax.numpy as jnp
import numpy as np
from jax import lax
from jax.experimental import pallas as pl
from jax.experimental.pallas import tpu as pltpu

EPS = 1e-8  # matches nn.LayerNorm(input_, eps=1e-08)


def _layernorm(x, w, b, inv_l):
    """LayerNorm over the last axis of x (B, C, L); w, b broadcastable (1, 1, L).

    One-pass stats: sum(x) and sum(x*x) are independent reductions (overlap on the
    XLU), and the normalization uses an EUP rsqrt + VALU multiply instead of a
    full-tile divide.
    """
    s1 = jnp.sum(x, axis=-1, keepdims=True)
    s2 = jnp.sum(x * x, axis=-1, keepdims=True)
    mu = s1 * inv_l
    var = jnp.maximum(s2 * inv_l - mu * mu, 0.0)
    inv = lax.rsqrt(var + EPS)
    return (x - mu) * inv * w + b


def residual_block_kernel(
    x_ref,      # (B_TILE, C_in, L)
    ln_ref,     # (8, L)  rows: ln1_w, ln1_b, ln2_w, ln2_b, ln3_w, ln3_b, 0, 0
    w1_ref,     # (C_mid, C_in)
    w2_ref,     # (C_mid, C_mid)
    w3_ref,     # (C_out, C_mid)
    bias_ref,   # (C_mid + C_out, 1)  rows: conv1 bias then conv3 bias
    o_ref,      # (B_TILE, C_out, L)
):
    x = x_ref[...].astype(jnp.float32)                        # (B, C_in, L)
    B = x.shape[0]
    C_mid = w1_ref.shape[0]
    C_out = w3_ref.shape[0]
    inv_l = jnp.float32(1.0 / x.shape[-1])

    ln = ln_ref[...]                                          # (8, L)
    row = lambda i: ln[i:i + 1, :][None]                      # -> (1, 1, L)

    b1 = bias_ref[0:C_mid, :][None]                           # (1, C_mid, 1)
    b3 = bias_ref[C_mid:C_mid + C_out, :][None]               # (1, C_out, 1)

    # Broadcast the 1x1-conv weights once (hoisted) so each conv is a single
    # batched MXU matmul over the whole batch tile.
    w1 = jnp.broadcast_to(w1_ref[...][None], (B,) + w1_ref.shape)
    w2 = jnp.broadcast_to(w2_ref[...][None], (B,) + w2_ref.shape)
    w3 = jnp.broadcast_to(w3_ref[...][None], (B,) + w3_ref.shape)

    # layernorm1 -> relu -> conv1 (1x1, bias)
    h = jnp.maximum(_layernorm(x, row(0), row(1), inv_l), 0.0)
    h = jnp.einsum("boc,bcl->bol", w1, h,
                   preferred_element_type=jnp.float32) + b1   # (B, C_mid, L)

    # layernorm2 -> relu -> conv2 (causal 1x1, no bias; k=1 causal pad is a no-op)
    h = jnp.maximum(_layernorm(h, row(2), row(3), inv_l), 0.0)
    h = jnp.einsum("boc,bcl->bol", w2, h,
                   preferred_element_type=jnp.float32)        # (B, C_mid, L)

    # layernorm3 -> relu -> conv3 (1x1, bias)
    h = jnp.maximum(_layernorm(h, row(4), row(5), inv_l), 0.0)
    h = jnp.einsum("boc,bcl->bol", w3, h,
                   preferred_element_type=jnp.float32) + b3   # (B, C_out, L)

    # residual add (requires C_out == C_in, as in PyTorch's `out += x`)
    o_ref[...] = (h + x).astype(o_ref.dtype)


def residual_block(x, params, *, b_tile=None):
    """x: (N, C_in, L) float32 (PyTorch Conv1d NCL layout). params: see _init_params."""
    N, C_in, L = x.shape
    C_mid = params["w1"].shape[0]
    C_out = params["w3"].shape[0]
    assert C_out == C_in, "residual add requires output_channels == input_channel"

    # Whole batch (or a B_TILE of it) per grid step: amortizes per-step overhead.
    # For large N on v7x, pick b_tile so that >= 2 grid steps remain (2 TensorCores).
    b_tile = b_tile or min(N, 8)
    assert N % b_tile == 0, "b_tile must divide N"
    grid = (N // b_tile,)

    # Consolidate the 12 small parameter inputs into 6:
    #  - six (1, L) LayerNorm vectors -> one sublane-aligned (8, L) buffer
    #  - conv1 / conv3 biases -> one (C_mid + C_out, 1) column
    ln_pack = jnp.concatenate(
        [params["ln1_w"], params["ln1_b"],
         params["ln2_w"], params["ln2_b"],
         params["ln3_w"], params["ln3_b"],
         jnp.zeros((2, L), jnp.float32)], axis=0)
    bias_pack = jnp.concatenate([params["b1"], params["b3"]], axis=0)

    full = lambda shape: pl.BlockSpec(shape, lambda b: tuple(0 for _ in shape))

    return pl.pallas_call(
        residual_block_kernel,
        out_shape=jax.ShapeDtypeStruct((N, C_out, L), x.dtype),
        grid_spec=pltpu.PrefetchScalarGridSpec(
            num_scalar_prefetch=0,
            grid=grid,
            in_specs=[
                pl.BlockSpec((b_tile, C_in, L), lambda b: (b, 0, 0)),  # x
                full((8, L)),                                          # packed LN params
                full((C_mid, C_in)),                                   # conv1 weight
                full((C_mid, C_mid)),                                  # conv2 weight
                full((C_out, C_mid)),                                  # conv3 weight
                full((C_mid + C_out, 1)),                              # packed biases
            ],
            out_specs=pl.BlockSpec((b_tile, C_out, L), lambda b: (b, 0, 0)),
        ),
        compiler_params=pltpu.CompilerParams(
            dimension_semantics=("parallel",)),  # batch axis is independent (v7x 2-TC)
    )(x, ln_pack, params["w1"], params["w2"], params["w3"], bias_pack)


def _init_params(key, L, C_in, C_mid, C_out):
    ks = jax.random.split(key, 6)
    return {
        # LayerNorm params: PyTorch init is weight=1, bias=0; perturb deterministically
        # so the affine part is actually exercised.
        "ln1_w": (1.0 + 0.1 * jax.random.normal(ks[0], (1, L))).astype(jnp.float32),
        "ln1_b": (0.1 * jax.random.normal(ks[1], (1, L))).astype(jnp.float32),
        "ln2_w": (1.0 + 0.1 * jax.random.normal(ks[2], (1, L))).astype(jnp.float32),
        "ln2_b": (0.1 * jax.random.normal(ks[3], (1, L))).astype(jnp.float32),
        "ln3_w": jnp.ones((1, L), jnp.float32),
        "ln3_b": jnp.zeros((1, L), jnp.float32),
        # Conv1d kernel_size=1 weights (out_ch, in_ch, 1) stored as (out_ch, in_ch).
        "w1": (0.2 * jax.random.normal(ks[4], (C_mid, C_in))).astype(jnp.float32),
        "b1": (0.05 * jnp.arange(C_mid, dtype=jnp.float32)).reshape(C_mid, 1),
        "w2": (0.2 * jax.random.normal(ks[5], (C_mid, C_mid))).astype(jnp.float32),
        "w3": (0.1 * jnp.sin(jnp.arange(C_out * C_mid, dtype=jnp.float32))).reshape(C_out, C_mid),
        "b3": (0.03 * jnp.arange(C_out, dtype=jnp.float32)).reshape(C_out, 1),
    }


def _reference(x, p):
    def ln(h, w, b):
        mu = jnp.mean(h, axis=-1, keepdims=True)
        var = jnp.mean((h - mu) ** 2, axis=-1, keepdims=True)
        return (h - mu) / jnp.sqrt(var + EPS) * w + b

    h = jnp.maximum(ln(x, p["ln1_w"], p["ln1_b"]), 0.0)
    h = jnp.einsum("oc,ncl->nol", p["w1"], h) + p["b1"][None]
    h = jnp.maximum(ln(h, p["ln2_w"], p["ln2_b"]), 0.0)
    h = jnp.einsum("oc,ncl->nol", p["w2"], h)
    h = jnp.maximum(ln(h, p["ln3_w"], p["ln3_b"]), 0.0)
    h = jnp.einsum("oc,ncl->nol", p["w3"], h) + p["b3"][None]
    return h + x


if __name__ == "__main__":
    # ResidualBlock(input_=L, input_channel=5, interm_channels=20, output_channels=5,
    #               kernel_size=1, dilation=1, causal=True)
    N, C_in, C_mid, C_out, L = 2, 5, 20, 5, 128

    key = jax.random.PRNGKey(0)
    kx, kp = jax.random.split(key)
    x = jax.random.normal(kx, (N, C_in, L), dtype=jnp.float32)
    params = _init_params(kp, L, C_in, C_mid, C_out)

    out = jax.block_until_ready(residual_block(x, params))

    ref = _reference(x, params)
    np.testing.assert_allclose(np.asarray(out), np.asarray(ref), atol=1e-4, rtol=1e-4)

    print("KERNEL_OK")
</pallas_src>

<mosaic_0001>
module attributes {stable_mosaic.version = 11 : i64} {
  func.func @residual_block_kernel(%arg0: i32, %arg1: memref<2x5x128xf32, #tpu.memory_space<vmem>>, %arg2: memref<8x128xf32, #tpu.memory_space<vmem>>, %arg3: memref<20x5xf32, #tpu.memory_space<vmem>>, %arg4: memref<20x20xf32, #tpu.memory_space<vmem>>, %arg5: memref<5x20xf32, #tpu.memory_space<vmem>>, %arg6: memref<25x1xf32, #tpu.memory_space<vmem>>, %arg7: memref<2x5x128xf32, #tpu.memory_space<vmem>>) attributes {dimension_semantics = [#tpu.dimension_semantics<parallel>], iteration_bounds = array<i64: 1>, scalar_prefetch = 0 : i64, scratch_operands = 0 : i64, tpu.core_type = #tpu.core_type<tc>, window_params = [{transform_indices = @transform_0, window_bounds = array<i64: 2, 5, 128>}, {pipeline_mode = #tpu.pipeline_mode<synchronous>, transform_indices = @transform_1, window_bounds = array<i64: 8, 128>}, {pipeline_mode = #tpu.pipeline_mode<synchronous>, transform_indices = @transform_2, window_bounds = array<i64: 20, 5>}, {pipeline_mode = #tpu.pipeline_mode<synchronous>, transform_indices = @transform_3, window_bounds = array<i64: 20, 20>}, {pipeline_mode = #tpu.pipeline_mode<synchronous>, transform_indices = @transform_4, window_bounds = array<i64: 5, 20>}, {pipeline_mode = #tpu.pipeline_mode<synchronous>, transform_indices = @transform_5, window_bounds = array<i64: 25, 1>}, {transform_indices = @transform_6, window_bounds = array<i64: 2, 5, 128>}]} {
    %c0 = arith.constant 0 : index
    %c0_0 = arith.constant 0 : index
    %c0_1 = arith.constant 0 : index
    %0 = vector.load %arg1[%c0, %c0_0, %c0_1] : memref<2x5x128xf32, #tpu.memory_space<vmem>>, vector<2x5x128xf32>
    %c0_2 = arith.constant 0 : index
    %c0_3 = arith.constant 0 : index
    %1 = vector.load %arg2[%c0_2, %c0_3] : memref<8x128xf32, #tpu.memory_space<vmem>>, vector<8x128xf32>
    %c0_4 = arith.constant 0 : index
    %c0_5 = arith.constant 0 : index
    %2 = vector.load %arg6[%c0_4, %c0_5] : memref<25x1xf32, #tpu.memory_space<vmem>>, vector<20x1xf32>
    %3 = vector.shape_cast %2 : vector<20x1xf32> to vector<1x20x1xf32>
    %c20 = arith.constant 20 : index
    %c0_6 = arith.constant 0 : index
    %4 = vector.load %arg6[%c20, %c0_6] : memref<25x1xf32, #tpu.memory_space<vmem>>, vector<5x1xf32>
    %5 = vector.shape_cast %4 : vector<5x1xf32> to vector<1x5x1xf32>
    %c0_7 = arith.constant 0 : index
    %c0_8 = arith.constant 0 : index
    %6 = vector.load %arg3[%c0_7, %c0_8] : memref<20x5xf32, #tpu.memory_space<vmem>>, vector<20x5xf32>
    %7 = vector.shape_cast %6 : vector<20x5xf32> to vector<1x20x5xf32>
    %8 = vector.shape_cast %7 : vector<1x20x5xf32> to vector<1x20x5xf32>
    %9 = vector.broadcast %8 : vector<1x20x5xf32> to vector<2x20x5xf32>
    %c0_9 = arith.constant 0 : index
    %c0_10 = arith.constant 0 : index
    %10 = vector.load %arg4[%c0_9, %c0_10] : memref<20x20xf32, #tpu.memory_space<vmem>>, vector<20x20xf32>
    %11 = vector.shape_cast %10 : vector<20x20xf32> to vector<1x20x20xf32>
    %12 = vector.shape_cast %11 : vector<1x20x20xf32> to vector<1x20x20xf32>
    %13 = vector.broadcast %12 : vector<1x20x20xf32> to vector<2x20x20xf32>
    %c0_11 = arith.constant 0 : index
    %c0_12 = arith.constant 0 : index
    %14 = vector.load %arg5[%c0_11, %c0_12] : memref<5x20xf32, #tpu.memory_space<vmem>>, vector<5x20xf32>
    %15 = vector.shape_cast %14 : vector<5x20xf32> to vector<1x5x20xf32>
    %16 = vector.shape_cast %15 : vector<1x5x20xf32> to vector<1x5x20xf32>
    %17 = vector.broadcast %16 : vector<1x5x20xf32> to vector<2x5x20xf32>
    %18 = vector.extract_strided_slice %1 {offsets = [0, 0], sizes = [1, 128], strides = [1, 1]} : vector<8x128xf32> to vector<1x128xf32>
    %19 = vector.shape_cast %18 : vector<1x128xf32> to vector<1x1x128xf32>
    %20 = vector.extract_strided_slice %1 {offsets = [1, 0], sizes = [1, 128], strides = [1, 1]} : vector<8x128xf32> to vector<1x128xf32>
    %21 = vector.shape_cast %20 : vector<1x128xf32> to vector<1x1x128xf32>
    %cst = arith.constant dense<0.000000e+00> : vector<2x5xf32>
    %22 = vector.multi_reduction <add>, %0, %cst [2] : vector<2x5x128xf32> to vector<2x5xf32>
    %23 = vector.shape_cast %22 : vector<2x5xf32> to vector<2x5x1xf32>
    %24 = arith.mulf %0, %0 : vector<2x5x128xf32>
    %cst_13 = arith.constant dense<0.000000e+00> : vector<2x5xf32>
    %25 = vector.multi_reduction <add>, %24, %cst_13 [2] : vector<2x5x128xf32> to vector<2x5xf32>
    %26 = vector.shape_cast %25 : vector<2x5xf32> to vector<2x5x1xf32>
    %cst_14 = arith.constant 7.812500e-03 : f32
    %27 = vector.broadcast %cst_14 : f32 to vector<2x5x1xf32>
    %28 = arith.mulf %23, %27 : vector<2x5x1xf32>
    %cst_15 = arith.constant 7.812500e-03 : f32
    %29 = vector.broadcast %cst_15 : f32 to vector<2x5x1xf32>
    %30 = arith.mulf %26, %29 : vector<2x5x1xf32>
    %31 = arith.mulf %28, %28 : vector<2x5x1xf32>
    %32 = arith.subf %30, %31 : vector<2x5x1xf32>
    %cst_16 = arith.constant 0.000000e+00 : f32
    %33 = vector.broadcast %cst_16 : f32 to vector<2x5x1xf32>
    %34 = arith.maximumf %32, %33 : vector<2x5x1xf32>
    %cst_17 = arith.constant 9.99999993E-9 : f32
    %35 = vector.broadcast %cst_17 : f32 to vector<2x5x1xf32>
    %36 = arith.addf %34, %35 : vector<2x5x1xf32>
    %37 = math.rsqrt %36 : vector<2x5x1xf32>
    %38 = vector.broadcast %28 : vector<2x5x1xf32> to vector<2x5x128xf32>
    %39 = arith.subf %0, %38 : vector<2x5x128xf32>
    %40 = vector.broadcast %37 : vector<2x5x1xf32> to vector<2x5x128xf32>
    %41 = arith.mulf %39, %40 : vector<2x5x128xf32>
    %42 = vector.broadcast %19 : vector<1x1x128xf32> to vector<2x5x128xf32>
    %43 = arith.mulf %41, %42 : vector<2x5x128xf32>
    %44 = vector.broadcast %21 : vector<1x1x128xf32> to vector<2x5x128xf32>
    %45 = arith.addf %43, %44 : vector<2x5x128xf32>
    %cst_18 = arith.constant 0.000000e+00 : f32
    %46 = vector.broadcast %cst_18 : f32 to vector<2x5x128xf32>
    %47 = arith.maximumf %45, %46 : vector<2x5x128xf32>
    "tpu.trace_start"() <{level = 10 : i32, message = "boc,bcl->bol"}> : () -> ()
    %cst_19 = arith.constant dense<0.000000e+00> : vector<2x20x128xf32>
    %48 = tpu.matmul %9, %47, %cst_19 {dimension_numbers = #tpu.dot_dimension_numbers<[2], [1], [1], [2], [0, 0, 0, 1, 1, 2], [0], [0]>} : vector<2x20x5xf32>, vector<2x5x128xf32>, vector<2x20x128xf32> -> vector<2x20x128xf32>
    "tpu.trace_stop"() : () -> ()
    %49 = vector.broadcast %3 : vector<1x20x1xf32> to vector<2x20x128xf32>
    %50 = arith.addf %48, %49 : vector<2x20x128xf32>
    %51 = vector.extract_strided_slice %1 {offsets = [2, 0], sizes = [1, 128], strides = [1, 1]} : vector<8x128xf32> to vector<1x128xf32>
    %52 = vector.shape_cast %51 : vector<1x128xf32> to vector<1x1x128xf32>
    %53 = vector.extract_strided_slice %1 {offsets = [3, 0], sizes = [1, 128], strides = [1, 1]} : vector<8x128xf32> to vector<1x128xf32>
    %54 = vector.shape_cast %53 : vector<1x128xf32> to vector<1x1x128xf32>
    %cst_20 = arith.constant dense<0.000000e+00> : vector<2x20xf32>
    %55 = vector.multi_reduction <add>, %50, %cst_20 [2] : vector<2x20x128xf32> to vector<2x20xf32>
    %56 = vector.shape_cast %55 : vector<2x20xf32> to vector<2x20x1xf32>
    %57 = arith.mulf %50, %50 : vector<2x20x128xf32>
    %cst_21 = arith.constant dense<0.000000e+00> : vector<2x20xf32>
    %58 = vector.multi_reduction <add>, %57, %cst_21 [2] : vector<2x20x128xf32> to vector<2x20xf32>
    %59 = vector.shape_cast %58 : vector<2x20xf32> to vector<2x20x1xf32>
    %cst_22 = arith.constant 7.812500e-03 : f32
    %60 = vector.broadcast %cst_22 : f32 to vector<2x20x1xf32>
    %61 = arith.mulf %56, %60 : vector<2x20x1xf32>
    %cst_23 = arith.constant 7.812500e-03 : f32
    %62 = vector.broadcast %cst_23 : f32 to vector<2x20x1xf32>
    %63 = arith.mulf %59, %62 : vector<2x20x1xf32>
    %64 = arith.mulf %61, %61 : vector<2x20x1xf32>
    %65 = arith.subf %63, %64 : vector<2x20x1xf32>
    %cst_24 = arith.constant 0.000000e+00 : f32
    %66 = vector.broadcast %cst_24 : f32 to vector<2x20x1xf32>
    %67 = arith.maximumf %65, %66 : vector<2x20x1xf32>
    %cst_25 = arith.constant 9.99999993E-9 : f32
    %68 = vector.broadcast %cst_25 : f32 to vector<2x20x1xf32>
    %69 = arith.addf %67, %68 : vector<2x20x1xf32>
    %70 = math.rsqrt %69 : vector<2x20x1xf32>
    %71 = vector.broadcast %61 : vector<2x20x1xf32> to vector<2x20x128xf32>
    %72 = arith.subf %50, %71 : vector<2x20x128xf32>
    %73 = vector.broadcast %70 : vector<2x20x1xf32> to vector<2x20x128xf32>
    %74 = arith.mulf %72, %73 : vector<2x20x128xf32>
    %75 = vector.broadcast %52 : vector<1x1x128xf32> to vector<2x20x128xf32>
    %76 = arith.mulf %74, %75 : vector<2x20x128xf32>
    %77 = vector.broadcast %54 : vector<1x1x128xf32> to vector<2x20x128xf32>
    %78 = arith.addf %76, %77 : vector<2x20x128xf32>
    %cst_26 = arith.constant 0.000000e+00 : f32
    %79 = vector.broadcast %cst_26 : f32 to vector<2x20x128xf32>
    %80 = arith.maximumf %78, %79 : vector<2x20x128xf32>
    "tpu.trace_start"() <{level = 10 : i32, message = "boc,bcl->bol"}> : () -> ()
    %cst_27 = arith.constant dense<0.000000e+00> : vector<2x20x128xf32>
    %81 = tpu.matmul %13, %80, %cst_27 {dimension_numbers = #tpu.dot_dimension_numbers<[2], [1], [1], [2], [0, 0, 0, 1, 1, 2], [0], [0]>} : vector<2x20x20xf32>, vector<2x20x128xf32>, vector<2x20x128xf32> -> vector<2x20x128xf32>
    "tpu.trace_stop"() : () -> ()
    %82 = vector.extract_strided_slice %1 {offsets = [4, 0], sizes = [1, 128], strides = [1, 1]} : vector<8x128xf32> to vector<1x128xf32>
    %83 = vector.shape_cast %82 : vector<1x128xf32> to vector<1x1x128xf32>
    %84 = vector.extract_strided_slice %1 {offsets = [5, 0], sizes = [1, 128], strides = [1, 1]} : vector<8x128xf32> to vector<1x128xf32>
    %85 = vector.shape_cast %84 : vector<1x128xf32> to vector<1x1x128xf32>
    %cst_28 = arith.constant dense<0.000000e+00> : vector<2x20xf32>
    %86 = vector.multi_reduction <add>, %81, %cst_28 [2] : vector<2x20x128xf32> to vector<2x20xf32>
    %87 = vector.shape_cast %86 : vector<2x20xf32> to vector<2x20x1xf32>
    %88 = arith.mulf %81, %81 : vector<2x20x128xf32>
    %cst_29 = arith.constant dense<0.000000e+00> : vector<2x20xf32>
    %89 = vector.multi_reduction <add>, %88, %cst_29 [2] : vector<2x20x128xf32> to vector<2x20xf32>
    %90 = vector.shape_cast %89 : vector<2x20xf32> to vector<2x20x1xf32>
    %cst_30 = arith.constant 7.812500e-03 : f32
    %91 = vector.broadcast %cst_30 : f32 to vector<2x20x1xf32>
    %92 = arith.mulf %87, %91 : vector<2x20x1xf32>
    %cst_31 = arith.constant 7.812500e-03 : f32
    %93 = vector.broadcast %cst_31 : f32 to vector<2x20x1xf32>
    %94 = arith.mulf %90, %93 : vector<2x20x1xf32>
    %95 = arith.mulf %92, %92 : vector<2x20x1xf32>
    %96 = arith.subf %94, %95 : vector<2x20x1xf32>
    %cst_32 = arith.constant 0.000000e+00 : f32
    %97 = vector.broadcast %cst_32 : f32 to vector<2x20x1xf32>
    %98 = arith.maximumf %96, %97 : vector<2x20x1xf32>
    %cst_33 = arith.constant 9.99999993E-9 : f32
    %99 = vector.broadcast %cst_33 : f32 to vector<2x20x1xf32>
    %100 = arith.addf %98, %99 : vector<2x20x1xf32>
    %101 = math.rsqrt %100 : vector<2x20x1xf32>
    %102 = vector.broadcast %92 : vector<2x20x1xf32> to vector<2x20x128xf32>
    %103 = arith.subf %81, %102 : vector<2x20x128xf32>
    %104 = vector.broadcast %101 : vector<2x20x1xf32> to vector<2x20x128xf32>
    %105 = arith.mulf %103, %104 : vector<2x20x128xf32>
    %106 = vector.broadcast %83 : vector<1x1x128xf32> to vector<2x20x128xf32>
    %107 = arith.mulf %105, %106 : vector<2x20x128xf32>
    %108 = vector.broadcast %85 : vector<1x1x128xf32> to vector<2x20x128xf32>
    %109 = arith.addf %107, %108 : vector<2x20x128xf32>
    %cst_34 = arith.constant 0.000000e+00 : f32
    %110 = vector.broadcast %cst_34 : f32 to vector<2x20x128xf32>
    %111 = arith.maximumf %109, %110 : vector<2x20x128xf32>
    "tpu.trace_start"() <{level = 10 : i32, message = "boc,bcl->bol"}> : () -> ()
    %cst_35 = arith.constant dense<0.000000e+00> : vector<2x5x128xf32>
    %112 = tpu.matmul %17, %111, %cst_35 {dimension_numbers = #tpu.dot_dimension_numbers<[2], [1], [1], [2], [0, 0, 0, 1, 1, 2], [0], [0]>} : vector<2x5x20xf32>, vector<2x20x128xf32>, vector<2x5x128xf32> -> vector<2x5x128xf32>
    "tpu.trace_stop"() : () -> ()
    %113 = vector.broadcast %5 : vector<1x5x1xf32> to vector<2x5x128xf32>
    %114 = arith.addf %112, %113 : vector<2x5x128xf32>
    %115 = arith.addf %114, %0 : vector<2x5x128xf32>
    %c0_36 = arith.constant 0 : index
    %c0_37 = arith.constant 0 : index
    %c0_38 = arith.constant 0 : index
    %116 = vector.load %arg7[%c0_36, %c0_37, %c0_38] : memref<2x5x128xf32, #tpu.memory_space<vmem>>, vector<2x5x128xf32>
    tpu.vector_store %arg7[%c0_36, %c0_37, %c0_38], %115 {strides = array<i32>} : memref<2x5x128xf32, #tpu.memory_space<vmem>>, vector<2x5x128xf32>,
    return
  }
  func.func @transform_0(%arg0: i32) -> (i32, i32, i32) {
    %c0_i32 = arith.constant 0 : i32
    %c0_i32_0 = arith.constant 0 : i32
    %c0_i32_1 = arith.constant 0 : i32
    return %arg0, %c0_i32, %c0_i32_0 : i32, i32, i32
  }
  func.func @transform_1(%arg0: i32) -> (i32, i32) {
    %c0_i32 = arith.constant 0 : i32
    %c0_i32_0 = arith.constant 0 : i32
    %c0_i32_1 = arith.constant 0 : i32
    return %c0_i32, %c0_i32_0 : i32, i32
  }
  func.func @transform_2(%arg0: i32) -> (i32, i32) {
    %c0_i32 = arith.constant 0 : i32
    %c0_i32_0 = arith.constant 0 : i32
    %c0_i32_1 = arith.constant 0 : i32
    return %c0_i32, %c0_i32_0 : i32, i32
  }
  func.func @transform_3(%arg0: i32) -> (i32, i32) {
    %c0_i32 = arith.constant 0 : i32
    %c0_i32_0 = arith.constant 0 : i32
    %c0_i32_1 = arith.constant 0 : i32
    return %c0_i32, %c0_i32_0 : i32, i32
  }
  func.func @transform_4(%arg0: i32) -> (i32, i32) {
    %c0_i32 = arith.constant 0 : i32
    %c0_i32_0 = arith.constant 0 : i32
    %c0_i32_1 = arith.constant 0 : i32
    return %c0_i32, %c0_i32_0 : i32, i32
  }
  func.func @transform_5(%arg0: i32) -> (i32, i32) {
    %c0_i32 = arith.constant 0 : i32
    %c0_i32_0 = arith.constant 0 : i32
    %c0_i32_1 = arith.constant 0 : i32
    return %c0_i32, %c0_i32_0 : i32, i32
  }
  func.func @transform_6(%arg0: i32) -> (i32, i32, i32) {
    %c0_i32 = arith.constant 0 : i32
    %c0_i32_0 = arith.constant 0 : i32
    %c0_i32_1 = arith.constant 0 : i32
    return %arg0, %c0_i32, %c0_i32_0 : i32, i32, i32
  }
}

</mosaic_0001>

<bundles_post_ra>
// kernel: tpu_custom_call.1
= control target key start
LH: loop header
LB: loop body
LE: loop exit
PB: predicated region body
PF: predicated region fallthrough
CT: control target
= control target key end

     0   :  { %vm37_vm0 = vcmask 1044480   ;;  %v993_v8 = vmov 0.0   ;;  %v70_v9 = vlaneseq  ;;  %vm994_vm1 = vmmov 0   ;;  %s1271_s0 = inlined_call_operand.vmem [shape: f32[2,5,128], index: 0, kind: input, shape index: {}]   ;;  %s1272_s1 = inlined_call_operand.vmem [shape: f32[8,128], index: 1, kind: input, shape index: {}]   ;;  %s1273_s5 = inlined_call_operand.vmem [shape: f32[25,1], index: 5, kind: input, shape index: {}]   ;;  %s1274_s2 = inlined_call_operand.vmem [shape: f32[20,5], index: 2, kind: input, shape index: {}]   ;;  %s1275_s3 = inlined_call_operand.vmem [shape: f32[20,20], index: 3, kind: input, shape index: {}]   ;;  %s1276_s4 = inlined_call_operand.vmem [shape: f32[5,20], index: 4, kind: input, shape index: {}]   ;;  %s1277_s6 = inlined_call_operand.vmem [shape: f32[2,5,128], index: 6, kind: output, shape index: {}]  }
   0x1   :  { %v1034_v0 = vld [vmem:[%s1271_s0] sm:$0x1f]  ;;  %v1039_v1 = vld [vmem:[%s1271_s0 + $0x8] sm:$0x1f]  ;;  %890 = vmatprep.subr.mxu0 %v993_v8  ;;  %901 = vmatprep.subr.mxu1 %v993_v8  ;;  %v995_v20 = vmov 0   ;;  %vm99_vm2 = vcmask 39936  }
   0x2   :  { %v38_v2 = vsel %vm37_vm0, %v1034_v0, 0.0  ;;  %v44_v3 = vmul.f32 %v1034_v0, %v1034_v0  ;;  %v45_v4 = vmul.f32 %v1039_v1, %v1039_v1  ;;  %v41_v6 = vsel %vm37_vm0, %v1039_v1, 0.0  ;;  %892 = vmatprep.mubr.msk.f32.mxu0 %vm994_vm1, %v993_v8  ;;  %903 = vmatprep.mubr.msk.f32.mxu1 %vm994_vm1, %v993_v8  ;;  %v25_v15 = vld [vmem:[%s1272_s1] sm:$0xff]  ;;  %v27_v21 = vld [vmem:[%s1273_s5 + $0x8] sm:$0xff]  ;;  %v28_v22 = vld [vmem:[%s1273_s5 + $0x10] sm:$0xf] }
   0x3   :  { %39 = vadd.xlane.f32.xlu0 %v38_v2  ;;  %v71_v10 = vshrl.u32 %v70_v9, 7  ;;  %964 = vset.pattern.permute.xlu1 %v995_v20  ;;  %v26_v23 = vld [vmem:[%s1273_s5] sm:$0xff]  ;;  %v31_v57 = vld [vmem:[%s1274_s2 + $0x8] sm:$0xff]  ;;  %v32_v58 = vld [vmem:[%s1274_s2 + $0x10] sm:$0xf]  ;;  %vm279_vm3 = vcmask 1043456  }
   0x4   :  { %v46_v5 = vsel %vm37_vm0, %v44_v3, 0.0  ;;  %v49_v7 = vsel %vm37_vm0, %v45_v4, 0.0  ;;  %963 = vset.pattern.permute.xlu0 %v995_v20  ;;  %v30_v53 = vld [vmem:[%s1274_s2] sm:$0xff]  ;;  %vm390_vm4 = vcmask 162816  }
   0x5   :  { %47 = vadd.xlane.f32.xlu1 %v46_v5  ;;  %v366_v11 = vsub.s32 2, %v71_v10  ;;  %v376_v12 = vsub.s32 3, %v71_v10  ;;  %v656_v13 = vsub.s32 4, %v71_v10  ;;  %v666_v14 = vsub.s32 5, %v71_v10 }
   0x6   :  { %v72_v40 = vsub.s32 0, %v71_v10  ;;  %v78_v41 = vsub.s32 1, %v71_v10 }
   0x7   :  { %42 = vadd.xlane.f32.xlu0 %v41_v6  ;;  %v1060_v16 = vrot.slane %v25_v15, %v366_v11  ;;  %v1062_v17 = vrot.slane %v25_v15, %v376_v12  ;;  %v1064_v18 = vrot.slane %v25_v15, %v656_v13  ;;  %v1066_v19 = vrot.slane %v25_v15, %v666_v14 }
   0x8   :  { %v73_v43 = vrot.slane %v25_v15, %v72_v40  ;;  %v79_v46 = vrot.slane %v25_v15, %v78_v41 }
   0x9   :  { %50 = vadd.xlane.f32.xlu1 %v49_v7 }
  0x1a   :  { %91 = vperm.xlu1 %964, %v27_v21  }
  0x1d   :  { %96 = vperm.xlu0 %963, %v28_v22  }
  0x1e   :  { %86 = vperm.xlu1 %964, %v26_v23  }
  0x8c   :  { %v40_v24 = vpop.xlane.xlu0 %39 }
  0x8d   :  { %v52_v25 = vmul.f32 0.0078125, %v40_v24 }
  0x8e   :  { %v48_v26 = vpop.xlane.xlu1 %47 }
  0x8f   :  { %v56_v27 = vmul.f32 %v52_v25, %v52_v25  ;;  %v54_v28 = vmul.f32 0.0078125, %v48_v26  ;;  %v66_v42 = vsub.f32 %v1034_v0, %v52_v25 }
  0x90   :  { %v43_v29 = vpop.xlane.xlu0 %42 }
  0x91   :  { %v58_v30 = vsub.f32 %v54_v28, %v56_v27  ;;  %v53_v31 = vmul.f32 0.0078125, %v43_v29 }
  0x92   :  { %v51_v32 = vpop.xlane.xlu1 %50 }
  0x93   :  { %v60_v33 = vmax.f32 %v58_v30, 0.0  ;;  %v57_v34 = vmul.f32 %v53_v31, %v53_v31  ;;  %v55_v35 = vmul.f32 0.0078125, %v51_v32  ;;  %v67_v47 = vsub.f32 %v1039_v1, %v53_v31 }
  0x95   :  { %v62_v36 = vadd.f32 1e-08, %v60_v33  ;;  %v59_v37 = vsub.f32 %v55_v35, %v57_v34 }
  0x96   :  { %v92_v59 = vpop.permute.xlu1 %91 }
  0x97   :  { %965 = vrsqrt.f32 %v62_v36  ;;  %v61_v38 = vmax.f32 %v59_v37, 0.0 }
  0x98   :  { %v97_v12 = vpop.permute.xlu0 %96 }
  0x99   :  { %v63_v39 = vadd.f32 1e-08, %v61_v38 }
  0x9a   :  { %v87_v60 = vpop.permute.xlu1 %86 }
  0x9b   :  { %967 = vrsqrt.f32 %v63_v39 }
  0xa4   :  { %v966_v44 = vpop.eup %965 }
  0xa5   :  { %v68_v45 = vmul.f32 %v966_v44, %v66_v42 }
  0xa7   :  { %v74_v48 = vmul.f32 %v73_v43, %v68_v45 }
  0xa8   :  { %v968_v49 = vpop.eup %967 }
  0xa9   :  { %v80_v50 = vadd.f32 %v79_v46, %v74_v48  ;;  %v69_v51 = vmul.f32 %v968_v49, %v67_v47 }
  0xab   :  { %v82_v52 = vmax.f32 %v80_v50, 0.0  ;;  %v75_v54 = vmul.f32 %v73_v43, %v69_v51 }
  0xad   :  { %891 = vmatpush3.msk.msra.mxu0 %vm37_vm0, %v82_v52  ;;  %v81_v55 = vadd.f32 %v79_v46, %v75_v54 }
  0xae   :  { %893 = vmatmul.mubr.msk.f32.vlgmr.msra.gmra.mxu0 %vm99_vm2, %v30_v53  ;;  %912 = vmatprep.subr.mxu0 %v993_v8 }
  0xaf   :  { %895 = vmatprep.mubr.msk.f32.mxu0 %vm994_vm1, %v993_v8  ;;  %v83_v56 = vmax.f32 %v81_v55, 0.0 }
  0xb1   :  { %902 = vmatpush3.msk.msra.mxu1 %vm37_vm0, %v83_v56 }
  0xb2   :  { %896 = vmatmul.mubr.msk.f32.gmra.mxu0 %vm99_vm2, %v31_v57  ;;  %904 = vmatmul.mubr.msk.f32.vlgmr.msra.gmra.mxu1 %vm99_vm2, %v30_v53 }
  0xb3   :  { %906 = vmatprep.mubr.msk.f32.mxu1 %vm994_vm1, %v993_v8  ;;  %898 = vmatprep.mubr.msk.f32.mxu0 %vm994_vm1, %v993_v8 }
  0xb4   :  { %927 = vmatprep.subr.mxu1 %v993_v8 }
  0xb6   :  { %907 = vmatmul.mubr.msk.f32.gmra.mxu1 %vm99_vm2, %v31_v57  ;;  %899 = vmatmul.mubr.msk.f32.gmra.mxu0 %vm99_vm2, %v32_v58 }
  0xb7   :  { %909 = vmatprep.mubr.msk.f32.mxu1 %vm994_vm1, %v993_v8  ;;  %918 = vmatprep.mubr.msk.f32.mxu0 %vm994_vm1, %v993_v8 }
  0xba   :  { %910 = vmatmul.mubr.msk.f32.gmra.mxu1 %vm99_vm2, %v32_v58 }
  0xbb   :  { %933 = vmatprep.mubr.msk.f32.mxu1 %vm994_vm1, %v993_v8 }
 0x16e   :  { %v178_v61 = vpop.f32.mrf.mxu0 }
 0x16f   :  { %v1110_v62 = vadd.f32 %v178_v61, %v87_v60 }
 0x170   :  { %v894_v63 = vpop.f32.mrf.mxu0 }
 0x171   :  { %275 = vadd.xlane.f32.xlu1 %v1110_v62  ;;  %v290_v32 = vmul.f32 %v1110_v62, %v1110_v62 }
 0x172   :  { %v183_v2 = vpop.f32.mrf.mxu0  ;;  %v261_v3 = vpop.f32.mrf.mxu1 }
 0x173   :  { %v1113_v4 = vadd.f32 %v183_v2, %v92_v59  ;;  %v1115_v5 = vadd.f32 %v261_v3, %v87_v60 }
 0x174   :  { %v897_v6 = vpop.f32.mrf.mxu0  ;;  %v905_v7 = vpop.f32.mrf.mxu1 }
 0x175   :  { %277 = vadd.xlane.f32.xlu1 %v1113_v4  ;;  %283 = vadd.xlane.f32.xlu0 %v1115_v5  ;;  %v291_v22 = vmul.f32 %v1113_v4, %v1113_v4  ;;  %v293_v29 = vmul.f32 %v1115_v5, %v1115_v5 }
 0x176   :  { %v266_v9 = vpop.f32.mrf.mxu1  ;;  %v188_v10 = vpop.f32.mrf.mxu0 }
 0x177   :  { %v1119_v11 = vadd.f32 %v266_v9, %v92_v59  ;;  %v1122_v20 = vadd.f32 %v188_v10, %v97_v12 }
 0x178   :  { %v908_v13 = vpop.f32.mrf.mxu1  ;;  %v900_v14 = vpop.f32.mrf.mxu0 }
 0x179   :  { %285 = vadd.xlane.f32.xlu1 %v1119_v11  ;;  %v280_v25 = vsel %vm279_vm3, %v1122_v20, 0.0  ;;  %v294_v26 = vmul.f32 %v1119_v11, %v1119_v11  ;;  %v292_v27 = vmul.f32 %v1122_v20, %v1122_v20 }
 0x17a   :  { %v271_v15 = vpop.f32.mrf.mxu1 }
 0x17b   :  { %v1124_v21 = vadd.f32 %v271_v15, %v97_v12  ;;  %v300_v28 = vsel %vm279_vm3, %v292_v27, 0.0 }
 0x17c   :  { %v911_v23 = vpop.f32.mrf.mxu1 }
 0x17d   :  { %298 = vadd.xlane.f32.xlu1 %v291_v22  ;;  %v287_v24 = vsel %vm279_vm3, %v1124_v21, 0.0  ;;  %v295_v30 = vmul.f32 %v1124_v21, %v1124_v21 }
 0x17e   :  { %288 = vadd.xlane.f32.xlu0 %v287_v24 }
 0x17f   :  { %v307_v31 = vsel %vm279_vm3, %v295_v30, 0.0 }
 0x181   :  { %281 = vadd.xlane.f32.xlu1 %v280_v25 }
 0x182   :  { %305 = vadd.xlane.f32.xlu0 %v294_v26 }
 0x185   :  { %301 = vadd.xlane.f32.xlu1 %v300_v28 }
 0x186   :  { %303 = vadd.xlane.f32.xlu0 %v293_v29 }
 0x189   :  { %308 = vadd.xlane.f32.xlu1 %v307_v31 }
 0x18d   :  { %296 = vadd.xlane.f32.xlu1 %v290_v32 }
 0x1fa   :  { %v276_v33 = vpop.xlane.xlu1 %275 }
 0x1fb   :  { %v310_v6 = vmul.f32 0.0078125, %v276_v33 }
 0x1fd   :  { %v322_v23 = vmul.f32 %v310_v6, %v310_v6 }
 0x1fe   :  { %v278_v34 = vpop.xlane.xlu1 %277  ;;  %v284_v37 = vpop.xlane.xlu0 %283 }
 0x1ff   :  { %v311_v36 = vmul.f32 0.0078125, %v278_v34  ;;  %v313_v48 = vmul.f32 0.0078125, %v284_v37 }
 0x201   :  { %v323_v39 = vmul.f32 %v311_v36, %v311_v36  ;;  %v325_v57 = vmul.f32 %v313_v48, %v313_v48  ;;  %v353_v28 = vsub.f32 %v1113_v4, %v311_v36 }
 0x202   :  { %v286_v35 = vpop.xlane.xlu1 %285 }
 0x203   :  { %v314_v42 = vmul.f32 0.0078125, %v286_v35 }
 0x205   :  { %v326_v49 = vmul.f32 %v314_v42, %v314_v42  ;;  %v356_v34 = vsub.f32 %v1119_v11, %v314_v42 }
 0x206   :  { %v299_v38 = vpop.xlane.xlu1 %298 }
 0x207   :  { %v317_v40 = vmul.f32 0.0078125, %v299_v38  ;;  %v289_v41 = vpop.xlane.xlu0 %288 }
 0x208   :  { %v315_v60 = vmul.f32 0.0078125, %v289_v41  ;;  %v355_v41 = vsub.f32 %v1115_v5, %v313_v48  ;;  %v352_v5 = vsub.f32 %v1110_v62, %v310_v6 }
 0x209   :  { %v329_v43 = vsub.f32 %v317_v40, %v323_v39 }
 0x20a   :  { %v282_v44 = vpop.xlane.xlu1 %281  ;;  %v327_v7 = vmul.f32 %v315_v60, %v315_v60 }
 0x20b   :  { %v335_v45 = vmax.f32 %v329_v43, 0.0  ;;  %v312_v46 = vmul.f32 0.0078125, %v282_v44  ;;  %v306_v47 = vpop.xlane.xlu0 %305 }
 0x20c   :  { %v320_v50 = vmul.f32 0.0078125, %v306_v47  ;;  %v357_v47 = vsub.f32 %v1124_v21, %v315_v60  ;;  %v33_v60 = vld [vmem:[%s1275_s3] sm:$0xff] }
 0x20d   :  { %v341_v51 = vadd.f32 1e-08, %v335_v45  ;;  %v324_v54 = vmul.f32 %v312_v46, %v312_v46  ;;  %v354_v39 = vsub.f32 %v1122_v20, %v312_v46 }
 0x20e   :  { %v332_v52 = vsub.f32 %v320_v50, %v326_v49  ;;  %v302_v53 = vpop.xlane.xlu1 %301 }
 0x20f   :  { %969 = vrsqrt.f32 %v341_v51  ;;  %v318_v55 = vmul.f32 0.0078125, %v302_v53  ;;  %v304_v56 = vpop.xlane.xlu0 %303 }
 0x210   :  { %v338_v58 = vmax.f32 %v332_v52, 0.0  ;;  %v319_v59 = vmul.f32 0.0078125, %v304_v56 }
 0x211   :  { %v330_v61 = vsub.f32 %v318_v55, %v324_v54 }
 0x212   :  { %v344_v63 = vadd.f32 1e-08, %v338_v58  ;;  %v331_v2 = vsub.f32 %v319_v59, %v325_v57  ;;  %v309_v3 = vpop.xlane.xlu1 %308 }
 0x213   :  { %v336_v9 = vmax.f32 %v330_v61, 0.0  ;;  %v321_v10 = vmul.f32 0.0078125, %v309_v3 }
 0x214   :  { %971 = vrsqrt.f32 %v344_v63  ;;  %v337_v12 = vmax.f32 %v331_v2, 0.0 }
 0x215   :  { %v342_v13 = vadd.f32 1e-08, %v336_v9  ;;  %v333_v14 = vsub.f32 %v321_v10, %v327_v7 }
 0x216   :  { %v343_v15 = vadd.f32 1e-08, %v337_v12  ;;  %v297_v22 = vpop.xlane.xlu1 %296 }
 0x217   :  { %973 = vrsqrt.f32 %v342_v13  ;;  %v339_v24 = vmax.f32 %v333_v14, 0.0  ;;  %v316_v25 = vmul.f32 0.0078125, %v297_v22 }
 0x218   :  { %975 = vrsqrt.f32 %v343_v15 }
 0x219   :  { %v345_v26 = vadd.f32 1e-08, %v339_v24  ;;  %v328_v27 = vsub.f32 %v316_v25, %v322_v23 }
 0x21b   :  { %977 = vrsqrt.f32 %v345_v26  ;;  %v334_v29 = vmax.f32 %v328_v27, 0.0 }
 0x21c   :  { %v970_v30 = vpop.eup %969 }
 0x21d   :  { %v340_v31 = vadd.f32 1e-08, %v334_v29  ;;  %v359_v32 = vmul.f32 %v970_v30, %v353_v28 }
 0x21f   :  { %979 = vrsqrt.f32 %v340_v31  ;;  %v369_v33 = vmul.f32 %v1060_v16, %v359_v32  ;;  %v29_v32 = vld [vmem:[%s1273_s5 + $0x14] sm:$0x1f] }
 0x221   :  { %v972_v35 = vpop.eup %971  ;;  %v379_v37 = vadd.f32 %v1062_v17, %v369_v33 }
 0x222   :  { %v362_v38 = vmul.f32 %v972_v35, %v356_v34 }
 0x223   :  { %v385_v53 = vmax.f32 %v379_v37, 0.0 }
 0x224   :  { %v974_v40 = vpop.eup %973  ;;  %v372_v4 = vmul.f32 %v1060_v16, %v362_v38 }
 0x225   :  { %v976_v36 = vpop.eup %975  ;;  %v360_v43 = vmul.f32 %v974_v40, %v354_v39 }
 0x226   :  { %v382_v44 = vadd.f32 %v1062_v17, %v372_v4  ;;  %v361_v45 = vmul.f32 %v976_v36, %v355_v41 }
 0x227   :  { %v370_v11 = vmul.f32 %v1060_v16, %v360_v43 }
 0x228   :  { %v978_v42 = vpop.eup %977  ;;  %v371_v49 = vmul.f32 %v1060_v16, %v361_v45  ;;  %v388_v62 = vmax.f32 %v382_v44, 0.0 }
 0x229   :  { %v380_v50 = vadd.f32 %v1062_v17, %v370_v11  ;;  %v363_v20 = vmul.f32 %v978_v42, %v357_v47 }
 0x22a   :  { %v381_v46 = vadd.f32 %v1062_v17, %v371_v49 }
 0x22b   :  { %v386_v48 = vmax.f32 %v380_v50, 0.0  ;;  %v373_v51 = vmul.f32 %v1060_v16, %v363_v20 }
 0x22c   :  { %v980_v52 = vpop.eup %979  ;;  %v387_v59 = vmax.f32 %v381_v46, 0.0 }
 0x22d   :  { %913 = vmatpush3.msk.msra.mxu0 %vm279_vm3, %v386_v48  ;;  %v383_v21 = vadd.f32 %v1062_v17, %v373_v51  ;;  %v358_v54 = vmul.f32 %v980_v52, %v352_v5 }
 0x22e   :  { %914 = vmatprep.subr.mxu0 %v993_v8 }
 0x22f   :  { %915 = vmatpush3.msra.mxu0 %v385_v53  ;;  %v389_v55 = vmax.f32 %v383_v21, 0.0  ;;  %v368_v56 = vmul.f32 %v1060_v16, %v358_v54  ;;  %v34_v16 = vld [vmem:[%s1275_s3 + $0x8] sm:$0xff] }
 0x230   :  { %916 = vmatprep.subr.mxu0 %v993_v8 }
 0x231   :  { %928 = vmatpush3.msk.msra.mxu1 %vm279_vm3, %v389_v55  ;;  %v378_v57 = vadd.f32 %v1062_v17, %v368_v56  ;;  %v35_v17 = vld [vmem:[%s1275_s3 + $0x10] sm:$0xf] }
 0x232   :  { %929 = vmatprep.subr.mxu1 %v993_v8 }
 0x233   :  { %930 = vmatpush3.msra.mxu1 %v388_v62  ;;  %v384_v58 = vmax.f32 %v378_v57, 0.0 }
 0x234   :  { %931 = vmatprep.subr.mxu1 %v993_v8 }
 0x235   :  { %917 = vmatpush3.msra.mxu0 %v384_v58  ;;  %932 = vmatpush3.msra.mxu1 %v387_v59 }
 0x236   :  { %919 = vmatmul.mubr.msk.f32.vlgmr.msra.gmra.mxu0 %vm390_vm4, %v33_v60  ;;  %934 = vmatmul.mubr.msk.f32.vlgmr.msra.gmra.mxu1 %vm390_vm4, %v33_v60 }
 0x237   :  { %921 = vmatprep.mubr.msk.f32.mxu0 %vm994_vm1, %v993_v8  ;;  %936 = vmatprep.mubr.msk.f32.mxu1 %vm994_vm1, %v993_v8 }
 0x238   :  { %942 = vmatprep.subr.mxu0 %v993_v8  ;;  %951 = vmatprep.subr.mxu1 %v993_v8 }
 0x23a   :  { %922 = vmatmul.mubr.msk.f32.gmra.mxu0 %vm390_vm4, %v34_v16  ;;  %937 = vmatmul.mubr.msk.f32.gmra.mxu1 %vm390_vm4, %v34_v16 }
 0x23b   :  { %924 = vmatprep.mubr.msk.f32.mxu0 %vm994_vm1, %v993_v8  ;;  %939 = vmatprep.mubr.msk.f32.mxu1 %vm994_vm1, %v993_v8 }
 0x23e   :  { %925 = vmatmul.mubr.msk.f32.gmra.mxu0 %vm390_vm4, %v35_v17  ;;  %940 = vmatmul.mubr.msk.f32.gmra.mxu1 %vm390_vm4, %v35_v17 }
 0x23f   :  { %948 = vmatprep.mubr.msk.f32.mxu0 %vm994_vm1, %v993_v8  ;;  %957 = vmatprep.mubr.msk.f32.mxu1 %vm994_vm1, %v993_v8 }
 0x2f6   :  { %v1197_v61 = vpop.f32.mrf.mxu0  ;;  %v1199_v63 = vpop.f32.mrf.mxu1 }
 0x2f7   :  { %566 = vadd.xlane.f32.xlu1 %v1197_v61  ;;  %573 = vadd.xlane.f32.xlu0 %v1199_v63  ;;  %v580_v30 = vmul.f32 %v1197_v61, %v1197_v61  ;;  %v583_v31 = vmul.f32 %v1199_v63, %v1199_v63 }
 0x2f8   :  { %v920_v2 = vpop.f32.mrf.mxu0  ;;  %v935_v3 = vpop.f32.mrf.mxu1 }
 0x2fa   :  { %v1203_v6 = vpop.f32.mrf.mxu0  ;;  %v1205_v7 = vpop.f32.mrf.mxu1 }
 0x2fb   :  { %568 = vadd.xlane.f32.xlu1 %v1203_v6  ;;  %575 = vadd.xlane.f32.xlu0 %v1205_v7  ;;  %v581_v12 = vmul.f32 %v1203_v6, %v1203_v6  ;;  %v584_v13 = vmul.f32 %v1205_v7, %v1205_v7 }
 0x2fc   :  { %v923_v9 = vpop.f32.mrf.mxu0  ;;  %v938_v10 = vpop.f32.mrf.mxu1 }
 0x2fe   :  { %v1213_v14 = vpop.f32.mrf.mxu0  ;;  %v1215_v15 = vpop.f32.mrf.mxu1 }
 0x2ff   :  { %588 = vadd.xlane.f32.xlu1 %v581_v12  ;;  %595 = vadd.xlane.f32.xlu0 %v584_v13  ;;  %v570_v24 = vsel %vm279_vm3, %v1213_v14, 0.0  ;;  %v577_v25 = vsel %vm279_vm3, %v1215_v15, 0.0  ;;  %v582_v26 = vmul.f32 %v1213_v14, %v1213_v14  ;;  %v585_v27 = vmul.f32 %v1215_v15, %v1215_v15 }
 0x300   :  { %v926_v22 = vpop.f32.mrf.mxu0  ;;  %v941_v23 = vpop.f32.mrf.mxu1 }
 0x301   :  { %v590_v28 = vsel %vm279_vm3, %v582_v26, 0.0  ;;  %v597_v29 = vsel %vm279_vm3, %v585_v27, 0.0 }
 0x303   :  { %571 = vadd.xlane.f32.xlu1 %v570_v24  ;;  %578 = vadd.xlane.f32.xlu0 %v577_v25 }
 0x307   :  { %591 = vadd.xlane.f32.xlu1 %v590_v28  ;;  %598 = vadd.xlane.f32.xlu0 %v597_v29 }
 0x30b   :  { %586 = vadd.xlane.f32.xlu1 %v580_v30  ;;  %593 = vadd.xlane.f32.xlu0 %v583_v31 }
 0x31c   :  { %682 = vperm.xlu1 %964, %v29_v32  }
 0x380   :  { %v567_v33 = vpop.xlane.xlu1 %566  ;;  %v574_v34 = vpop.xlane.xlu0 %573 }
 0x381   :  { %v600_v51 = vmul.f32 0.0078125, %v567_v33  ;;  %v603_v52 = vmul.f32 0.0078125, %v574_v34 }
 0x383   :  { %v612_v59 = vmul.f32 %v600_v51, %v600_v51  ;;  %v615_v60 = vmul.f32 %v603_v52, %v603_v52 }
 0x384   :  { %v569_v35 = vpop.xlane.xlu1 %568  ;;  %v576_v37 = vpop.xlane.xlu0 %575 }
 0x385   :  { %v601_v38 = vmul.f32 0.0078125, %v569_v35  ;;  %v604_v39 = vmul.f32 0.0078125, %v576_v37 }
 0x387   :  { %v613_v4 = vmul.f32 %v601_v38, %v601_v38  ;;  %v616_v36 = vmul.f32 %v604_v39, %v604_v39  ;;  %v643_v28 = vsub.f32 %v1203_v6, %v601_v38  ;;  %v646_v30 = vsub.f32 %v1205_v7, %v604_v39 }
 0x388   :  { %v589_v40 = vpop.xlane.xlu1 %588  ;;  %v596_v41 = vpop.xlane.xlu0 %595  ;;  %v642_v39 = vsub.f32 %v1197_v61, %v600_v51 }
 0x389   :  { %v607_v43 = vmul.f32 0.0078125, %v589_v40  ;;  %v610_v44 = vmul.f32 0.0078125, %v596_v41 }
 0x38b   :  { %v619_v45 = vsub.f32 %v607_v43, %v613_v4  ;;  %v622_v47 = vsub.f32 %v610_v44, %v616_v36 }
 0x38c   :  { %v572_v11 = vpop.xlane.xlu1 %571  ;;  %v579_v42 = vpop.xlane.xlu0 %578 }
 0x38d   :  { %v625_v49 = vmax.f32 %v619_v45, 0.0  ;;  %v628_v50 = vmax.f32 %v622_v47, 0.0  ;;  %v602_v20 = vmul.f32 0.0078125, %v572_v11  ;;  %v605_v46 = vmul.f32 0.0078125, %v579_v42 }
 0x38e   :  { %v645_v45 = vsub.f32 %v1199_v63, %v603_v52 }
 0x38f   :  { %v631_v5 = vadd.f32 1e-08, %v625_v49  ;;  %v634_v48 = vadd.f32 1e-08, %v628_v50  ;;  %v614_v53 = vmul.f32 %v602_v20, %v602_v20  ;;  %v617_v55 = vmul.f32 %v605_v46, %v605_v46 }
 0x390   :  { %v592_v21 = vpop.xlane.xlu1 %591  ;;  %v599_v54 = vpop.xlane.xlu0 %598  ;;  %v644_v41 = vsub.f32 %v1213_v14, %v602_v20  ;;  %v647_v6 = vsub.f32 %v1215_v15, %v605_v46 }
 0x391   :  { %981 = vrsqrt.f32 %v631_v5  ;;  %v608_v56 = vmul.f32 0.0078125, %v592_v21  ;;  %v611_v62 = vmul.f32 0.0078125, %v599_v54 }
 0x392   :  { %983 = vrsqrt.f32 %v634_v48 }
 0x393   :  { %v620_v57 = vsub.f32 %v608_v56, %v614_v53  ;;  %v623_v58 = vsub.f32 %v611_v62, %v617_v55 }
 0x394   :  { %v587_v16 = vpop.xlane.xlu1 %586  ;;  %v594_v17 = vpop.xlane.xlu0 %593 }
 0x395   :  { %v626_v2 = vmax.f32 %v620_v57, 0.0  ;;  %v629_v3 = vmax.f32 %v623_v58, 0.0  ;;  %v606_v9 = vmul.f32 0.0078125, %v587_v16  ;;  %v609_v10 = vmul.f32 0.0078125, %v594_v17 }
 0x397   :  { %v632_v12 = vadd.f32 1e-08, %v626_v2  ;;  %v635_v13 = vadd.f32 1e-08, %v629_v3  ;;  %v618_v22 = vsub.f32 %v606_v9, %v612_v59  ;;  %v621_v23 = vsub.f32 %v609_v10, %v615_v60 }
 0x399   :  { %985 = vrsqrt.f32 %v632_v12  ;;  %v624_v24 = vmax.f32 %v618_v22, 0.0  ;;  %v627_v25 = vmax.f32 %v621_v23, 0.0 }
 0x39a   :  { %987 = vrsqrt.f32 %v635_v13 }
 0x39b   :  { %v630_v26 = vadd.f32 1e-08, %v624_v24  ;;  %v633_v27 = vadd.f32 1e-08, %v627_v25 }
 0x39d   :  { %989 = vrsqrt.f32 %v630_v26 }
 0x39e   :  { %v982_v29 = vpop.eup %981  ;;  %991 = vrsqrt.f32 %v633_v27 }
 0x39f   :  { %v984_v31 = vpop.eup %983  ;;  %v649_v32 = vmul.f32 %v982_v29, %v643_v28 }
 0x3a0   :  { %v652_v33 = vmul.f32 %v984_v31, %v646_v30 }
 0x3a1   :  { %v659_v34 = vmul.f32 %v1064_v18, %v649_v32 }
 0x3a2   :  { %v662_v35 = vmul.f32 %v1064_v18, %v652_v33 }
 0x3a3   :  { %v669_v37 = vadd.f32 %v1066_v19, %v659_v34 }
 0x3a4   :  { %v672_v40 = vadd.f32 %v1066_v19, %v662_v35 }
 0x3a5   :  { %v675_v5 = vmax.f32 %v669_v37, 0.0 }
 0x3a6   :  { %v986_v4 = vpop.eup %985  ;;  %v678_v48 = vmax.f32 %v672_v40, 0.0 }
 0x3a7   :  { %v988_v38 = vpop.eup %987  ;;  %v650_v36 = vmul.f32 %v986_v4, %v644_v41 }
 0x3a8   :  { %v653_v7 = vmul.f32 %v988_v38, %v647_v6 }
 0x3a9   :  { %v660_v43 = vmul.f32 %v1064_v18, %v650_v36 }
 0x3aa   :  { %v990_v44 = vpop.eup %989  ;;  %v663_v47 = vmul.f32 %v1064_v18, %v653_v7 }
 0x3ab   :  { %v992_v11 = vpop.eup %991  ;;  %v670_v42 = vadd.f32 %v1066_v19, %v660_v43  ;;  %v648_v49 = vmul.f32 %v990_v44, %v642_v39 }
 0x3ac   :  { %v673_v14 = vadd.f32 %v1066_v19, %v663_v47  ;;  %v651_v50 = vmul.f32 %v992_v11, %v645_v45 }
 0x3ad   :  { %v676_v15 = vmax.f32 %v670_v42, 0.0  ;;  %v658_v20 = vmul.f32 %v1064_v18, %v648_v49 }
 0x3ae   :  { %v679_v46 = vmax.f32 %v673_v14, 0.0  ;;  %v661_v61 = vmul.f32 %v1064_v18, %v651_v50  ;;  %v36_v18 = vld [vmem:[%s1276_s4] sm:$0x1f] }
 0x3af   :  { %943 = vmatpush3.msk.msra.mxu0 %vm279_vm3, %v676_v15  ;;  %v668_v63 = vadd.f32 %v1066_v19, %v658_v20 }
 0x3b0   :  { %952 = vmatpush3.msk.msra.mxu1 %vm279_vm3, %v679_v46  ;;  %944 = vmatprep.subr.mxu0 %v993_v8  ;;  %v671_v51 = vadd.f32 %v1066_v19, %v661_v61  ;;  %v683_v19 = vpop.permute.xlu1 %682 }
 0x3b1   :  { %953 = vmatprep.subr.mxu1 %v993_v8  ;;  %945 = vmatpush3.msra.mxu0 %v675_v5  ;;  %v674_v52 = vmax.f32 %v668_v63, 0.0 }
 0x3b2   :  { %954 = vmatpush3.msra.mxu1 %v678_v48  ;;  %946 = vmatprep.subr.mxu0 %v993_v8  ;;  %v677_v53 = vmax.f32 %v671_v51, 0.0 }
 0x3b3   :  { %955 = vmatprep.subr.mxu1 %v993_v8  ;;  %947 = vmatpush3.msra.mxu0 %v674_v52 }
 0x3b4   :  { %956 = vmatpush3.msra.mxu1 %v677_v53  ;;  %949 = vmatmul.mubr.msk.f32.vlgmr.msra.gmra.mxu0 %vm390_vm4, %v36_v18 }
 0x3b5   :  { %958 = vmatmul.mubr.msk.f32.vlgmr.msra.gmra.mxu1 %vm390_vm4, %v36_v18 }
 0x474   :  { %v757_v21 = vpop.f32.mrf.mxu0 }
 0x475   :  { %v758_v54 = vadd.f32 %v757_v21, %v683_v19  ;;  %v830_v55 = vpop.f32.mrf.mxu1 }
 0x476   :  { %v831_v56 = vadd.f32 %v830_v55, %v683_v19  ;;  %v950_v62 = vpop.f32.mrf.mxu0 }
 0x477   :  { %v834_v57 = vadd.f32 %v758_v54, %v1034_v0  ;;  %v959_v58 = vpop.f32.mrf.mxu1 }
 0x478   :  { %v835_v59 = vadd.f32 %v831_v56, %v1039_v1 }
 0x479   :  { %836 = vst [vmem:[%s1277_s6] sm:$0x1f] %v834_v57 }
 0x47a   :  { %837 = vst [vmem:[%s1277_s6 + $0x8] sm:$0x1f] %v835_v59 }

</bundles_post_ra>
